<compile_context>
chip_gen: v7x
topology: tpu7x:2x2x1
jax: 0.10.0
libtpu: 0.0.40
codegen_flags: <defaults>
</compile_context>

<pallas_src>
import functools

import jax
import jax.numpy as jnp
from jax.experimental import pallas as pl
from jax.experimental.pallas import tpu as pltpu

LANES = 128
SUBLANES = 8
MAX_BLOCK_ROWS = 2048  # (2048, 128) f32 = 1 MiB per input per pipeline buffer


def _iou_partials_kernel(x_ref, t_ref, inter_ref, total_ref, *, rows, block_rows):
    """Per-grid-step (1, 8, 128) partial sums of sigmoid(x)*t and sigmoid(x)+t."""
    step = pl.program_id(0)

    s = jax.nn.sigmoid(x_ref[...].astype(jnp.float32))  # EUP transcendental
    t = t_ref[...].astype(jnp.float32)

    if rows % block_rows != 0:
        # Only the final block is partial; the mask is a few VPU ops per element
        # on a memory-bound kernel, so it is applied whenever statically needed.
        row = (jax.lax.broadcasted_iota(jnp.int32, (block_rows, LANES), 0)
               + step * block_rows)
        keep = row < rows
        s = jnp.where(keep, s, 0.0)
        t = jnp.where(keep, t, 0.0)

    # (block_rows, 128) -> (block_rows//8, 8, 128): tile-aligned reshape, then the
    # axis-0 sums are plain vreg adds on the VPU (no per-step cross-lane XLU work).
    s3 = s.reshape(-1, SUBLANES, LANES)
    t3 = t.reshape(-1, SUBLANES, LANES)
    inter_ref[...] = jnp.sum(s3 * t3, axis=0, keepdims=True)
    total_ref[...] = (jnp.sum(s3, axis=0, keepdims=True)
                      + jnp.sum(t3, axis=0, keepdims=True))


def _iou_partial_sums(x2, t2, rows, block_rows):
    steps = pl.cdiv(rows, block_rows)
    kernel = functools.partial(_iou_partials_kernel, rows=rows, block_rows=block_rows)
    return pl.pallas_call(
        kernel,
        out_shape=(
            jax.ShapeDtypeStruct((steps, SUBLANES, LANES), jnp.float32),
            jax.ShapeDtypeStruct((steps, SUBLANES, LANES), jnp.float32),
        ),
        grid_spec=pltpu.PrefetchScalarGridSpec(
            num_scalar_prefetch=0,
            grid=(steps,),
            in_specs=[
                pl.BlockSpec((block_rows, LANES), lambda i: (i, 0)),
                pl.BlockSpec((block_rows, LANES), lambda i: (i, 0)),
            ],
            out_specs=[
                pl.BlockSpec((1, SUBLANES, LANES), lambda i: (i, 0, 0)),
                pl.BlockSpec((1, SUBLANES, LANES), lambda i: (i, 0, 0)),
            ],
        ),
        compiler_params=pltpu.CompilerParams(
            # Independent row blocks -> shard across the 2 TensorCores on v7x;
            # harmless (sequential) on v5e/v6e.
            dimension_semantics=("parallel",),
        ),
    )(x2, t2)


@functools.partial(jax.jit, static_argnames=("smooth",))
def iou_loss(inputs, targets, smooth=1):
    """Pallas-TPU equivalent of IoULoss.forward(inputs, targets, smooth)."""
    # Flatten exactly like torch .view(-1); keep original dtype (cast in-kernel).
    x = jnp.reshape(inputs, (-1,))
    t = jnp.reshape(targets, (-1,))
    n = x.shape[0]

    tile = SUBLANES * LANES                 # 1024 elements = one (8, 128) tile
    main_n = (n // tile) * tile             # region processed by the kernel

    intersection = jnp.float32(0.0)
    total = jnp.float32(0.0)

    if main_n > 0:
        rows = main_n // LANES              # always a multiple of 8
        block_rows = min(MAX_BLOCK_ROWS, rows)
        # When n is tile-aligned (the common case) these slices/reshapes are
        # free bitcasts; only a ragged n pays one slice copy of the main region.
        x2 = x[:main_n].reshape(rows, LANES)
        t2 = t[:main_n].reshape(rows, LANES)
        inter_p, total_p = _iou_partial_sums(x2, t2, rows, block_rows)
        intersection = intersection + jnp.sum(inter_p)
        total = total + jnp.sum(total_p)

    if main_n < n:
        # < 1024-element ragged tail: negligible compute, done in plain JAX so we
        # never jnp.pad (which would cost a full extra HBM round trip).
        xs = jax.nn.sigmoid(x[main_n:].astype(jnp.float32))
        ts = t[main_n:].astype(jnp.float32)
        intersection = intersection + jnp.sum(xs * ts)
        total = total + jnp.sum(xs) + jnp.sum(ts)

    smooth_f = jnp.float32(smooth)
    union = total - intersection
    iou = (intersection + smooth_f) / (union + smooth_f)
    return 1.0 - iou


def _reference_iou_loss(inputs, targets, smooth=1):
    """Pure-JAX reference mirroring the PyTorch forward."""
    x = jax.nn.sigmoid(inputs.astype(jnp.float32)).reshape(-1)
    t = targets.astype(jnp.float32).reshape(-1)
    intersection = jnp.sum(x * t)
    total = jnp.sum(x + t)
    union = total - intersection
    return 1.0 - (intersection + smooth) / (union + smooth)


if __name__ == "__main__":
    key = jax.random.PRNGKey(0)
    k1, k2 = jax.random.split(key)

    # Primary small NCHW-like shape: batch=2, channels=4, spatial=16x16.
    inputs = jax.random.normal(k1, (2, 4, 16, 16), dtype=jnp.float32)
    targets = (jax.random.uniform(k2, (2, 4, 16, 16)) > 0.5).astype(jnp.float32)

    loss = iou_loss(inputs, targets, smooth=1)
    loss = jax.block_until_ready(loss)
    ref = _reference_iou_loss(inputs, targets, smooth=1)
    assert jnp.allclose(loss, ref, atol=1e-5, rtol=1e-5), (loss, ref)

    # Extra check: ragged size (exercises the plain-JAX tail path).
    k3, k4 = jax.random.split(k2)
    x_r = jax.random.normal(k3, (2, 4, 24, 24), dtype=jnp.float32)     # 4608 elems
    t_r = (jax.random.uniform(k4, (2, 4, 24, 24)) > 0.5).astype(jnp.float32)
    l_r = jax.block_until_ready(iou_loss(x_r, t_r, smooth=1))
    assert jnp.allclose(l_r, _reference_iou_loss(x_r, t_r, smooth=1),
                        atol=1e-5, rtol=1e-5), l_r

    # Extra check: multiple blocks with a partial last block (mask path).
    k5, k6 = jax.random.split(k4)
    x_m = jax.random.normal(k5, (2, 4, 200, 200), dtype=jnp.float32)   # 320000 elems
    t_m = (jax.random.uniform(k6, (2, 4, 200, 200)) > 0.5).astype(jnp.float32)
    l_m = jax.block_until_ready(iou_loss(x_m, t_m, smooth=1))
    assert jnp.allclose(l_m, _reference_iou_loss(x_m, t_m, smooth=1),
                        atol=1e-5, rtol=1e-5), l_m

    print("KERNEL_OK")
</pallas_src>

<mosaic_0001>
module attributes {stable_mosaic.version = 11 : i64} {
  func.func @_iou_partials_kernel(%arg0: i32, %arg1: memref<16x128xf32, #tpu.memory_space<vmem>>, %arg2: memref<16x128xf32, #tpu.memory_space<vmem>>, %arg3: memref<1x8x128xf32, #tpu.memory_space<vmem>>, %arg4: memref<1x8x128xf32, #tpu.memory_space<vmem>>) attributes {dimension_semantics = [#tpu.dimension_semantics<parallel>], iteration_bounds = array<i64: 1>, scalar_prefetch = 0 : i64, scratch_operands = 0 : i64, tpu.core_type = #tpu.core_type<tc>, window_params = [{transform_indices = @transform_0, window_bounds = array<i64: 16, 128>}, {transform_indices = @transform_1, window_bounds = array<i64: 16, 128>}, {transform_indices = @transform_2, window_bounds = array<i64: 1, 8, 128>}, {transform_indices = @transform_3, window_bounds = array<i64: 1, 8, 128>}]} {
    %c0 = arith.constant 0 : index
    %c0_0 = arith.constant 0 : index
    %0 = vector.load %arg1[%c0, %c0_0] : memref<16x128xf32, #tpu.memory_space<vmem>>, vector<16x128xf32>
    %1 = arith.negf %0 : vector<16x128xf32>
    %2 = math.exp %1 : vector<16x128xf32>
    %cst = arith.constant 1.000000e+00 : f32
    %3 = vector.broadcast %cst : f32 to vector<16x128xf32>
    %4 = arith.addf %3, %2 : vector<16x128xf32>
    %5 = arith.divf %3, %4 : vector<16x128xf32>
    %c0_1 = arith.constant 0 : index
    %c0_2 = arith.constant 0 : index
    %6 = vector.load %arg2[%c0_1, %c0_2] : memref<16x128xf32, #tpu.memory_space<vmem>>, vector<16x128xf32>
    %7 = vector.shape_cast %5 : vector<16x128xf32> to vector<2x8x128xf32>
    %8 = vector.shape_cast %6 : vector<16x128xf32> to vector<2x8x128xf32>
    %9 = arith.mulf %7, %8 : vector<2x8x128xf32>
    %cst_3 = arith.constant dense<0.000000e+00> : vector<8x128xf32>
    %10 = vector.multi_reduction <add>, %9, %cst_3 [0] : vector<2x8x128xf32> to vector<8x128xf32>
    %11 = vector.shape_cast %10 : vector<8x128xf32> to vector<1x8x128xf32>
    %c0_4 = arith.constant 0 : index
    %c0_5 = arith.constant 0 : index
    %c0_6 = arith.constant 0 : index
    %12 = vector.load %arg3[%c0_4, %c0_5, %c0_6] : memref<1x8x128xf32, #tpu.memory_space<vmem>>, vector<1x8x128xf32>
    tpu.vector_store %arg3[%c0_4, %c0_5, %c0_6], %11 {strides = array<i32>} : memref<1x8x128xf32, #tpu.memory_space<vmem>>, vector<1x8x128xf32>,
    %cst_7 = arith.constant dense<0.000000e+00> : vector<8x128xf32>
    %13 = vector.multi_reduction <add>, %7, %cst_7 [0] : vector<2x8x128xf32> to vector<8x128xf32>
    %14 = vector.shape_cast %13 : vector<8x128xf32> to vector<1x8x128xf32>
    %cst_8 = arith.constant dense<0.000000e+00> : vector<8x128xf32>
    %15 = vector.multi_reduction <add>, %8, %cst_8 [0] : vector<2x8x128xf32> to vector<8x128xf32>
    %16 = vector.shape_cast %15 : vector<8x128xf32> to vector<1x8x128xf32>
    %17 = arith.addf %14, %16 : vector<1x8x128xf32>
    %c0_9 = arith.constant 0 : index
    %c0_10 = arith.constant 0 : index
    %c0_11 = arith.constant 0 : index
    %18 = vector.load %arg4[%c0_9, %c0_10, %c0_11] : memref<1x8x128xf32, #tpu.memory_space<vmem>>, vector<1x8x128xf32>
    tpu.vector_store %arg4[%c0_9, %c0_10, %c0_11], %17 {strides = array<i32>} : memref<1x8x128xf32, #tpu.memory_space<vmem>>, vector<1x8x128xf32>,
    return
  }
  func.func @transform_0(%arg0: i32) -> (i32, i32) {
    %c0_i32 = arith.constant 0 : i32
    %c0_i32_0 = arith.constant 0 : i32
    return %arg0, %c0_i32 : i32, i32
  }
  func.func @transform_1(%arg0: i32) -> (i32, i32) {
    %c0_i32 = arith.constant 0 : i32
    %c0_i32_0 = arith.constant 0 : i32
    return %arg0, %c0_i32 : i32, i32
  }
  func.func @transform_2(%arg0: i32) -> (i32, i32, i32) {
    %c0_i32 = arith.constant 0 : i32
    %c0_i32_0 = arith.constant 0 : i32
    %c0_i32_1 = arith.constant 0 : i32
    return %arg0, %c0_i32, %c0_i32_0 : i32, i32, i32
  }
  func.func @transform_3(%arg0: i32) -> (i32, i32, i32) {
    %c0_i32 = arith.constant 0 : i32
    %c0_i32_0 = arith.constant 0 : i32
    %c0_i32_1 = arith.constant 0 : i32
    return %arg0, %c0_i32, %c0_i32_0 : i32, i32, i32
  }
}

</mosaic_0001>

<bundles_post_ra>
// kernel: iou_loss.1
= control target key start
LH: loop header
LB: loop body
LE: loop exit
PB: predicated region body
PF: predicated region fallthrough
CT: control target
= control target key end

     0   :  { %s93_s0 = inlined_call_operand.vmem [shape: f32[16,128], index: 0, kind: input, shape index: {}]   ;;  %s94_s1 = inlined_call_operand.vmem [shape: f32[16,128], index: 1, kind: input, shape index: {}]   ;;  %s95_s2 = inlined_call_operand.vmem [shape: f32[1,8,128], index: 2, kind: output, shape index: {0}]   ;;  %s96_s3 = inlined_call_operand.vmem [shape: f32[1,8,128], index: 3, kind: output, shape index: {1}]  }
   0x1   :  { %v13_v0 = vld [vmem:[%s93_s0] sm:$0xff]  ;;  %v14_v1 = vld [vmem:[%s93_s0 + $0x8] sm:$0xff] }
   0x2   :  { %v45_v2 = vmul.f32 -1.442695, %v13_v0  ;;  %v46_v3 = vmul.f32 -1.442695, %v14_v1  ;;  %v27_v8 = vld [vmem:[%s94_s1] sm:$0xff]  ;;  %v28_v9 = vld [vmem:[%s94_s1 + $0x8] sm:$0xff] }
   0x3   :  { %v34_v11 = vadd.f32 %v28_v9, %v27_v8 }
   0x4   :  { %47 = vpow2.f32 %v45_v2 }
   0x5   :  { %49 = vpow2.f32 %v46_v3 }
   0xe   :  { %v48_v4 = vpop.eup %47 }
   0xf   :  { %v50_v5 = vpop.eup %49  ;;  %v21_v6 = vadd.f32 1.0, %v48_v4 }
  0x10   :  { %v22_v7 = vadd.f32 1.0, %v50_v5 }
  0x11   :  { %51 = vrcp.f32 %v21_v6 }
  0x12   :  { %53 = vrcp.f32 %v22_v7 }
  0x1b   :  { %v52_v10 = vpop.eup %51 }
  0x1c   :  { %v54_v12 = vpop.eup %53  ;;  %v29_v13 = vmul.f32 %v52_v10, %v27_v8 }
  0x1d   :  { %v30_v14 = vmul.f32 %v54_v12, %v28_v9  ;;  %v33_v15 = vadd.f32 %v54_v12, %v52_v10 }
  0x1f   :  { %v31_v16 = vadd.f32 %v30_v14, %v29_v13  ;;  %v35_v17 = vadd.f32 %v34_v11, %v33_v15 }
  0x21   :  { %32 = vst [vmem:[%s95_s2] sm:$0xff] %v31_v16  ;;  %36 = vst [vmem:[%s96_s3] sm:$0xff] %v35_v17 }

</bundles_post_ra>
